<compile_context>
chip_gen: v7x
topology: tpu7x:2x2x1
jax: 0.10.0
libtpu: 0.0.40
codegen_flags: <defaults>
</compile_context>

<pallas_src>
import functools

import jax
import jax.numpy as jnp
from jax import lax
from jax.experimental import pallas as pl
from jax.experimental.pallas import tpu as pltpu

LANES = 128            # lane (last) dim of every block
MAX_BLOCK_ROWS = 4096  # 2 MiB f32 per input per grid step; safe on all gens
CHUNK_ROWS = 512       # in-kernel fold granularity (256 KiB f32 temporaries)
NC = 2                 # leading "parallel" grid axis -> both TCs on v7x


def _round_up(a, b):
    return -(-a // b) * b


def _dice_kernel(x_ref, t_ref, out_ref, *, bm, chunk, n_valid):
    """Accumulate per-core partial sums into the resident output block.

    out_ref block: (1, 2, 8, LANES) float32
      [0, 0] -> running sum of sigmoid(x) * t   (intersection)
      [0, 1] -> running sum of sigmoid(x) + t   (denominator)
    """
    core = pl.program_id(0)
    step = pl.program_id(1)
    steps = pl.num_programs(1)

    @pl.when(step == 0)
    def _():
        out_ref[...] = jnp.zeros_like(out_ref)

    # Logical (unclamped) first row of this block.  Used only for masking, so
    # clamped/duplicated over-coverage blocks and padded tail rows contribute
    # exactly zero regardless of what data was actually DMA'd.
    base_row = (core * steps + step) * bm

    full_rows = n_valid // LANES      # static Python ints baked into the kernel
    rem = n_valid % LANES
    num_chunks = bm // chunk

    local_rows = lax.broadcasted_iota(jnp.int32, (chunk, LANES), 0)
    lane_ids = lax.broadcasted_iota(jnp.int32, (chunk, LANES), 1)

    def body(j, carry):
        inter_acc, denom_acc = carry
        off = pl.multiple_of(j * chunk, 8)

        row_ids = local_rows + (base_row + j * chunk)
        # Element-validity mask: rows strictly below full_rows are fully valid;
        # the boundary row is valid only for lanes < rem.
        mask = (row_ids < full_rows) | ((row_ids == full_rows) & (lane_ids < rem))

        x = x_ref[pl.ds(off, chunk), :].astype(jnp.float32)
        t = t_ref[pl.ds(off, chunk), :].astype(jnp.float32)
        s = jnp.where(mask, jax.nn.sigmoid(x), 0.0)   # EUP; masked garbage -> 0
        tv = jnp.where(mask, t, 0.0)

        # Fold the (chunk, 128) sub-block down to one (8, 128) vreg tile.
        inter_acc = inter_acc + (s * tv).reshape(-1, 8, LANES).sum(axis=0)
        denom_acc = denom_acc + (s + tv).reshape(-1, 8, LANES).sum(axis=0)
        return inter_acc, denom_acc

    init = (jnp.zeros((8, LANES), jnp.float32),
            jnp.zeros((8, LANES), jnp.float32))
    inter_acc, denom_acc = lax.fori_loop(0, num_chunks, body, init, unroll=True)

    out_ref[0, 0, :, :] += inter_acc
    out_ref[0, 1, :, :] += denom_acc


def dice_loss(inputs, targets, smooth=1.0):
    """Matches torch: 1 - (2*sum(sig(x)*t)+s)/(sum(sig(x))+sum(t)+s)."""
    x = inputs.reshape(-1)
    t = targets.reshape(-1)
    if t.dtype == jnp.bool_:
        t = t.astype(jnp.int8)   # 1 B/elem in HBM; kernel upcasts in VMEM
    n = x.shape[0]

    rows = pl.cdiv(n, LANES)
    # Keep at least 32 rows so bm (a multiple of 32, required for int8/bf16/f32
    # tiling) never exceeds the array's row extent.  Pad only for lane
    # alignment / tiny inputs; pad contents are irrelevant (masked in-kernel).
    rows_arr = max(rows, 32)
    pad = rows_arr * LANES - n
    if pad:
        x = jnp.pad(x, (0, pad))
        t = jnp.pad(t, (0, pad))
    x2 = x.reshape(rows_arr, LANES)
    t2 = t.reshape(rows_arr, LANES)

    bm = min(MAX_BLOCK_ROWS, _round_up(pl.cdiv(rows_arr, NC), 32))
    if bm > CHUNK_ROWS:
        bm = min(MAX_BLOCK_ROWS, _round_up(bm, CHUNK_ROWS))
    chunk = min(bm, CHUNK_ROWS)   # bm % chunk == 0 by construction

    total_blocks = pl.cdiv(rows_arr, bm)
    steps = pl.cdiv(total_blocks, NC)
    last_block = total_blocks - 1

    def in_map(c, i):
        # Clamp over-coverage blocks onto the last valid block; their
        # contribution is zeroed by the in-kernel mask (derived from the
        # logical, unclamped index), so no wrapper-side padding is needed.
        return (jnp.minimum(c * steps + i, last_block), 0)

    kernel = functools.partial(_dice_kernel, bm=bm, chunk=chunk, n_valid=n)

    partials = pl.pallas_call(
        kernel,
        out_shape=jax.ShapeDtypeStruct((NC, 2, 8, LANES), jnp.float32),
        grid_spec=pltpu.PrefetchScalarGridSpec(
            num_scalar_prefetch=0,
            grid=(NC, steps),
            in_specs=[
                pl.BlockSpec((bm, LANES), in_map),
                pl.BlockSpec((bm, LANES), in_map),
            ],
            out_specs=pl.BlockSpec((1, 2, 8, LANES), lambda c, i: (c, 0, 0, 0)),
        ),
        compiler_params=pltpu.CompilerParams(
            dimension_semantics=("parallel", "arbitrary")
        ),
    )(x2, t2)

    # Final scalar combine in the wrapper epilogue.
    # TODO(synk): for >1e8 elements, consider a Kahan add on the accumulators
    # if exact float32 parity with the reference matters.
    inter = jnp.sum(partials[:, 0])
    denom = jnp.sum(partials[:, 1])
    smooth = jnp.float32(smooth)
    dice = (2.0 * inter + smooth) / (denom + smooth)
    return 1.0 - dice


if __name__ == "__main__":
    key = jax.random.PRNGKey(0)
    k1, k2 = jax.random.split(key)

    # NCHW logits and binary targets (DiceLoss has no parameters).
    x = jax.random.normal(k1, (2, 4, 16, 16), dtype=jnp.float32)
    tgt = (jax.random.uniform(k2, (2, 4, 16, 16)) > 0.5).astype(jnp.float32)

    loss = dice_loss(x, tgt, smooth=1.0)
    loss = jax.block_until_ready(loss)

    # Pure-JAX reference check.
    xs = jax.nn.sigmoid(x).reshape(-1)
    ts = tgt.reshape(-1)
    inter = jnp.sum(xs * ts)
    ref = 1.0 - (2.0 * inter + 1.0) / (jnp.sum(xs) + jnp.sum(ts) + 1.0)
    assert jnp.allclose(loss, ref, atol=1e-5, rtol=1e-5), (loss, ref)

    print("KERNEL_OK")
</pallas_src>

<mosaic_0001>
module attributes {stable_mosaic.version = 11 : i64} {
  func.func @_dice_kernel(%arg0: i32, %arg1: i32, %arg2: memref<32x128xf32, #tpu.memory_space<vmem>>, %arg3: memref<32x128xf32, #tpu.memory_space<vmem>>, %arg4: memref<1x2x8x128xf32, #tpu.memory_space<vmem>>) attributes {dimension_semantics = [#tpu.dimension_semantics<parallel>, #tpu.dimension_semantics<arbitrary>], iteration_bounds = array<i64: 2, 1>, scalar_prefetch = 0 : i64, scratch_operands = 0 : i64, tpu.core_type = #tpu.core_type<tc>, window_params = [{transform_indices = @transform_0, window_bounds = array<i64: 32, 128>}, {transform_indices = @transform_1, window_bounds = array<i64: 32, 128>}, {transform_indices = @transform_2, window_bounds = array<i64: 1, 2, 8, 128>}]} {
    %c0_i32 = arith.constant 0 : i32
    %0 = arith.cmpi eq, %arg1, %c0_i32 : i32
    %1 = arith.extui %0 : i1 to i32
    %c0_i32_0 = arith.constant 0 : i32
    %2 = arith.cmpi ne, %1, %c0_i32_0 : i32
    scf.if %2 {
      %cst_29 = arith.constant 0.000000e+00 : f32
      %57 = vector.broadcast %cst_29 : f32 to vector<1x2x8x128xf32>
      %c0_30 = arith.constant 0 : index
      %c0_31 = arith.constant 0 : index
      %c0_32 = arith.constant 0 : index
      %c0_33 = arith.constant 0 : index
      %58 = vector.load %arg4[%c0_30, %c0_31, %c0_32, %c0_33] : memref<1x2x8x128xf32, #tpu.memory_space<vmem>>, vector<1x2x8x128xf32>
      tpu.vector_store %arg4[%c0_30, %c0_31, %c0_32, %c0_33], %57 {strides = array<i32>} : memref<1x2x8x128xf32, #tpu.memory_space<vmem>>, vector<1x2x8x128xf32>,
    } else {
    }
    %c1_i32 = arith.constant 1 : i32
    %3 = arith.muli %arg0, %c1_i32 : i32
    %4 = arith.addi %3, %arg1 : i32
    %c32_i32 = arith.constant 32 : i32
    %5 = arith.muli %4, %c32_i32 : i32
    %6 = tpu.iota {dimensions = array<i32: 0>} : vector<32x128xi32>
    %7 = tpu.iota {dimensions = array<i32: 1>} : vector<32x128xi32>
    %cst = arith.constant 0.000000e+00 : f32
    %8 = vector.broadcast %cst : f32 to vector<8x128xf32>
    %cst_1 = arith.constant 0.000000e+00 : f32
    %9 = vector.broadcast %cst_1 : f32 to vector<8x128xf32>
    %c0_i32_2 = arith.constant 0 : i32
    %c32_i32_3 = arith.constant 32 : i32
    %10 = arith.muli %c0_i32_2, %c32_i32_3 : i32
    %11 = tpu.assume_multiple %10, 8 : i32
    %c32_i32_4 = arith.constant 32 : i32
    %12 = arith.muli %c0_i32_2, %c32_i32_4 : i32
    %13 = arith.addi %5, %12 : i32
    %14 = vector.broadcast %13 : i32 to vector<32x128xi32>
    %15 = arith.addi %6, %14 : vector<32x128xi32>
    %c16_i32 = arith.constant 16 : i32
    %16 = vector.broadcast %c16_i32 : i32 to vector<32x128xi32>
    %17 = arith.cmpi slt, %15, %16 : vector<32x128xi32>
    %c16_i32_5 = arith.constant 16 : i32
    %18 = vector.broadcast %c16_i32_5 : i32 to vector<32x128xi32>
    %19 = arith.cmpi eq, %15, %18 : vector<32x128xi32>
    %c0_i32_6 = arith.constant 0 : i32
    %20 = vector.broadcast %c0_i32_6 : i32 to vector<32x128xi32>
    %21 = arith.cmpi slt, %7, %20 : vector<32x128xi32>
    %22 = arith.andi %19, %21 : vector<32x128xi1>
    %23 = arith.ori %17, %22 : vector<32x128xi1>
    %24 = arith.index_cast %11 : i32 to index
    %c0 = arith.constant 0 : index
    %25 = vector.load %arg2[%24, %c0] : memref<32x128xf32, #tpu.memory_space<vmem>>, vector<32x128xf32>
    %26 = arith.index_cast %11 : i32 to index
    %c0_7 = arith.constant 0 : index
    %27 = vector.load %arg3[%26, %c0_7] : memref<32x128xf32, #tpu.memory_space<vmem>>, vector<32x128xf32>
    %28 = arith.negf %25 : vector<32x128xf32>
    %29 = math.exp %28 : vector<32x128xf32>
    %cst_8 = arith.constant 1.000000e+00 : f32
    %30 = vector.broadcast %cst_8 : f32 to vector<32x128xf32>
    %31 = arith.addf %30, %29 : vector<32x128xf32>
    %32 = arith.divf %30, %31 : vector<32x128xf32>
    %cst_9 = arith.constant 0.000000e+00 : f32
    %33 = vector.broadcast %cst_9 : f32 to vector<32x128xf32>
    %34 = arith.select %23, %32, %33 : vector<32x128xi1>, vector<32x128xf32>
    %cst_10 = arith.constant 0.000000e+00 : f32
    %35 = vector.broadcast %cst_10 : f32 to vector<32x128xf32>
    %36 = arith.select %23, %27, %35 : vector<32x128xi1>, vector<32x128xf32>
    %37 = arith.mulf %34, %36 : vector<32x128xf32>
    %38 = vector.shape_cast %37 : vector<32x128xf32> to vector<4x8x128xf32>
    %cst_11 = arith.constant dense<0.000000e+00> : vector<8x128xf32>
    %39 = vector.multi_reduction <add>, %38, %cst_11 [0] : vector<4x8x128xf32> to vector<8x128xf32>
    %40 = arith.addf %8, %39 : vector<8x128xf32>
    %41 = arith.addf %34, %36 : vector<32x128xf32>
    %42 = vector.shape_cast %41 : vector<32x128xf32> to vector<4x8x128xf32>
    %cst_12 = arith.constant dense<0.000000e+00> : vector<8x128xf32>
    %43 = vector.multi_reduction <add>, %42, %cst_12 [0] : vector<4x8x128xf32> to vector<8x128xf32>
    %44 = arith.addf %9, %43 : vector<8x128xf32>
    %c1_i32_13 = arith.constant 1 : i32
    %c0_14 = arith.constant 0 : index
    %c0_15 = arith.constant 0 : index
    %c0_16 = arith.constant 0 : index
    %c0_17 = arith.constant 0 : index
    %45 = vector.load %arg4[%c0_14, %c0_15, %c0_16, %c0_17] : memref<1x2x8x128xf32, #tpu.memory_space<vmem>>, vector<1x1x8x128xf32>
    %46 = vector.shape_cast %45 : vector<1x1x8x128xf32> to vector<8x128xf32>
    %47 = arith.addf %46, %40 : vector<8x128xf32>
    %c0_18 = arith.constant 0 : index
    %c0_19 = arith.constant 0 : index
    %c0_20 = arith.constant 0 : index
    %c0_21 = arith.constant 0 : index
    %48 = vector.load %arg4[%c0_18, %c0_19, %c0_20, %c0_21] : memref<1x2x8x128xf32, #tpu.memory_space<vmem>>, vector<1x1x8x128xf32>
    %49 = vector.shape_cast %48 : vector<1x1x8x128xf32> to vector<8x128xf32>
    %50 = vector.shape_cast %47 : vector<8x128xf32> to vector<1x1x8x128xf32>
    tpu.vector_store %arg4[%c0_18, %c0_19, %c0_20, %c0_21], %50 {strides = array<i32>} : memref<1x2x8x128xf32, #tpu.memory_space<vmem>>, vector<1x1x8x128xf32>,
    %c0_22 = arith.constant 0 : index
    %c1 = arith.constant 1 : index
    %c0_23 = arith.constant 0 : index
    %c0_24 = arith.constant 0 : index
    %51 = vector.load %arg4[%c0_22, %c1, %c0_23, %c0_24] : memref<1x2x8x128xf32, #tpu.memory_space<vmem>>, vector<1x1x8x128xf32>
    %52 = vector.shape_cast %51 : vector<1x1x8x128xf32> to vector<8x128xf32>
    %53 = arith.addf %52, %44 : vector<8x128xf32>
    %c0_25 = arith.constant 0 : index
    %c1_26 = arith.constant 1 : index
    %c0_27 = arith.constant 0 : index
    %c0_28 = arith.constant 0 : index
    %54 = vector.load %arg4[%c0_25, %c1_26, %c0_27, %c0_28] : memref<1x2x8x128xf32, #tpu.memory_space<vmem>>, vector<1x1x8x128xf32>
    %55 = vector.shape_cast %54 : vector<1x1x8x128xf32> to vector<8x128xf32>
    %56 = vector.shape_cast %53 : vector<8x128xf32> to vector<1x1x8x128xf32>
    tpu.vector_store %arg4[%c0_25, %c1_26, %c0_27, %c0_28], %56 {strides = array<i32>} : memref<1x2x8x128xf32, #tpu.memory_space<vmem>>, vector<1x1x8x128xf32>,
    return
  }
  func.func @transform_0(%arg0: i32, %arg1: i32) -> (i32, i32) {
    %c1_i32 = arith.constant 1 : i32
    %0 = arith.muli %arg0, %c1_i32 : i32
    %1 = arith.addi %0, %arg1 : i32
    %c0_i32 = arith.constant 0 : i32
    %2 = arith.minsi %1, %c0_i32 : i32
    %c0_i32_0 = arith.constant 0 : i32
    %c0_i32_1 = arith.constant 0 : i32
    return %2, %c0_i32_0 : i32, i32
  }
  func.func @transform_1(%arg0: i32, %arg1: i32) -> (i32, i32) {
    %c1_i32 = arith.constant 1 : i32
    %0 = arith.muli %arg0, %c1_i32 : i32
    %1 = arith.addi %0, %arg1 : i32
    %c0_i32 = arith.constant 0 : i32
    %2 = arith.minsi %1, %c0_i32 : i32
    %c0_i32_0 = arith.constant 0 : i32
    %c0_i32_1 = arith.constant 0 : i32
    return %2, %c0_i32_0 : i32, i32
  }
  func.func @transform_2(%arg0: i32, %arg1: i32) -> (i32, i32, i32, i32) {
    %c0_i32 = arith.constant 0 : i32
    %c0_i32_0 = arith.constant 0 : i32
    %c0_i32_1 = arith.constant 0 : i32
    %c0_i32_2 = arith.constant 0 : i32
    return %arg0, %c0_i32, %c0_i32_0, %c0_i32_1 : i32, i32, i32, i32
  }
}

</mosaic_0001>

<bundles_post_ra>
// kernel: tpu_custom_call.1
= control target key start
LH: loop header
LB: loop body
LE: loop exit
PB: predicated region body
PF: predicated region fallthrough
CT: control target
= control target key end

     0   :  { %7 = vsyncpa [#allocation3], 0  ;;  %s1011_s0 = inlined_call_operand.hbm [shape: f32[32,128], index: 0, kind: input, shape index: {}]   ;;  %s1012_s1 = inlined_call_operand.hbm [shape: f32[32,128], index: 1, kind: input, shape index: {}]   ;;  %s1013_s2 = inlined_call_operand.hbm [shape: f32[2,2,8,128], index: 2, kind: output, shape index: {}]  }
   0x1   :  { %9 = vsyncpa [#allocation3 + $0x1], 0 }
   0x2   :  { %10 = vsyncpa [#allocation6], 0 }
   0x3   :  { %12 = vsyncpa [#allocation6 + $0x1], 0 }
   0x4   :  { %13 = vsyncpa [#allocation4], 0 }
   0x5   :  { %15 = vsyncpa [#allocation4 + $0x1], 0  ;;  %s790_s9 = smov 0   ;;  %s792_s10 = smov 0  }
   0x6   :  { %s794_s11 = smov 0   ;;  %s796_s12 = smov 0  }
   0x7   :  { %s798_s13 = smov 0   ;;  %s800_s14 = smov 0  }
   0x8   :  { %s802_s15 = smov 0   ;;  %s804_s16 = smov 0  }
   0x9 LB: > { %s458_s17 = sadd.s32 4294967295, %s766_s16   ;;  %s459_s18 = sadd.s32 4294967294, %s766_s16   ;;  %s766_s16 = sphi %s804_s16, %s21_s16   ;;  %s762_s15 = sphi %s802_s15, %s1032_s15   ;;  %s758_s14 = sphi %s800_s14, %s1031_s14   ;;  %s754_s13 = sphi %s798_s13, %s1001_s13   ;;  %s750_s12 = sphi %s796_s12, %s1030_s12   ;;  %s746_s11 = sphi %s794_s11, %s1029_s11   ;;  %s742_s10 = sphi %s792_s10, %s1028_s10   ;;  %s738_s9 = sphi %s790_s9, %s1027_s9  }
   0xa   : > { %s33_s19 = sadd.s32 1, %s762_s15  ;;  %p735_p1 = scmp.ne.s32.totalorder %s754_s13, 0 }
   0xb   : > { %p35_p0 = scmp.ge.s32.totalorder %s33_s19, 2  ;;  %p54_p2 = scmp.eq.s32.totalorder %s766_s16, 0 }
   0xc   : > { %p59_p3 = scmp.ne.s32.totalorder %s754_s13, %s750_s12  ;;  %p60_p5 = scmp.eq.s32.totalorder %s458_s17, 0 }
   0xd   : > { %s1034_s19 = smov (%p35_p0, %s33_s19), 0  ;;  %p836_p4 = por %p735_p1, %p54_p2 }
   0xe   : > { %p840_p6 = por %p60_p5, %p59_p3  ;;  %s101_s22 = ssub.s32 %s762_s15, %s1034_s19 }
   0xf   : > { %p102_p7 = scmp.eq.s32.totalorder %s101_s22, 0  ;;  %s104_s23 = sadd.s32 1, %s746_s11 }
  0x10   : > { %s1017_s21 = scalar_select %p840_p6, 1, 0 }
  0x11   : > { %s848_s24 = scalar_select %p102_p7, %s746_s11, %s104_s23  }
  0x12   : > { %p114_p8 = scmp.ne.s32.totalorder %s746_s11, %s742_s10  ;;  %p115_p9 = scmp.eq.s32.totalorder %s458_s17, 1 }
  0x13   : > { %p120_p10 = scmp.ne.s32.totalorder %s742_s10, %s738_s9  ;;  %p121_p11 = scmp.eq.s32.totalorder %s459_s18, 1 }
  0x14   : > { %p854_p12 = por %p115_p9, %p114_p8  ;;  %p504_p1 = scmp.lt.s32.totalorder %s766_s16, 2 }
  0x15   : > { %p859_p0 = por %p121_p11, %p120_p10  ;;  %s768_s27 = smov [#allocation2]  }
  0x16   : > { %s1018_s25 = scalar_select %p854_p12, 1, 0 }
  0x17   : > { %s1019_s26 = scalar_select %p859_p0, 1, 0 }
  0x18   : > { %s155_s28 = sshll.u32 %s768_s27, 4  ;;  %p866_p2 = pnand %p504_p1, %p836_p4  ;;  %s156_s28 = int_to_ptr.vmem [resolvable:$true] %s155_s28 }
  0x19   : > { %s599_s4 = scalar_lea.hbm %s1011_s0, 512 }
  0x1a   : > { %p600_p3 = scmp.ne.s32.totalorder %s1011_s0, %s599_s4  ;;  %p601_p5 = pneg %p866_p2 }
  0x1b   : > { %p606_p8 = scmp.lt.u32.totalorder %s599_s4, %s599_s4  ;;  %p608_p9 = scmp.lt.u32.totalorder %s599_s4, %s1011_s0 }
  0x1c   : > { %p602_p7 = pnand %p601_p5, %p600_p3 }
  0x1d   : > { %p609_p10 = por %p608_p9, %p606_p8 }
  0x1e   : > { %p603_p4 = pneg %p602_p7 }
  0x20   : > { %p610_p11 = pnand %p609_p10, %p603_p4 }
  0x22   : > { %613 = shalt.err (!%p610_p11)
}
  0x23   : > { %s614_s12 = scalar_lea.vmem %s156_s28, 512  ;;  %s621_s17 = scalar_lea.vmem %s156_s28, 1024 }
  0x24   : > { %p615_p1 = scmp.ne.s32.totalorder %s156_s28, %s614_s12  ;;  %p622_p12 = scmp.lt.s32.totalorder %s156_s28, %s156_s28 }
  0x25   : > { %p623_p6 = scmp.lt.s32.totalorder %s621_s17, %s614_s12 }
  0x26   : > { %p617_p13 = pnand %p615_p1, %p601_p5 }
  0x27   : > { %p624_p3 = por %p623_p6, %p622_p12 }
  0x28   : > { %p618_p0 = pneg %p617_p13 }
  0x2a   : > { %p625_p7 = pnand %p624_p3, %p618_p0 }
  0x2c   : > { %628 = shalt.err (!%p625_p7)
}
  0x2d   : > { %s769_s18 = smov 128   ;;  %s770_s20 = smov 8  }
  0x2e   : > { %496 = dma.hbm_to_vmem [thread:$0]  (!%p866_p2), %s1011_s0, 512, %s156_s28, [#allocation3], %s769_s18, %s769_s18, %s770_s20  }
  0x2f   : > { %p468_p13 = scmp.ge.s32.totalorder %s766_s16, 1  ;;  %p187_p4 = scmp.lt.s32.totalorder %s766_s16, 3 }
  0x30   : > { %s771_s30 = smov [#allocation5]   ;;  %s629_s6 = scalar_lea.hbm %s1012_s1, 512 }
  0x31   : > { %p897_p8 = pnand %p468_p13, %p187_p4  ;;  %s179_s3 = sshll.u32 %s771_s30, 4  ;;  %s180_s3 = int_to_ptr.vmem [resolvable:$true] %s179_s3 }
  0x32   : > { %p630_p6 = scmp.ne.s32.totalorder %s1012_s1, %s629_s6  ;;  %p636_p9 = scmp.lt.u32.totalorder %s629_s6, %s629_s6 }
  0x33   : > { %s1021_s27 = scalar_select %p897_p8, 1, 0 }
  0x34   : > { %p632_p12 = pnand %p630_p6, %p601_p5  ;;  %p638_p10 = scmp.lt.u32.totalorder %s629_s6, %s1012_s1 }
  0x36   : > { %p633_p0 = pneg %p632_p12  ;;  %p639_p11 = por %p638_p10, %p636_p9 }
  0x38   : > { %p640_p1 = pnand %p639_p11, %p633_p0 }
  0x3a   : > { %643 = shalt.err (!%p640_p1)
}
  0x3b   : > { %s644_s17 = scalar_lea.vmem %s180_s3, 512  ;;  %s651_s22 = scalar_lea.vmem %s180_s3, 1024 }
  0x3c   : > { %p645_p3 = scmp.ne.s32.totalorder %s180_s3, %s644_s17  ;;  %p652_p4 = scmp.lt.s32.totalorder %s180_s3, %s180_s3 }
  0x3d   : > { %p653_p8 = scmp.lt.s32.totalorder %s651_s22, %s644_s17 }
  0x3e   : > { %p647_p7 = pnand %p645_p3, %p601_p5 }
  0x3f   : > { %p654_p6 = por %p653_p8, %p652_p4 }
  0x40   : > { %p648_p13 = pneg %p647_p7 }
  0x42   : > { %p655_p12 = pnand %p654_p6, %p648_p13 }
  0x44   : > { %658 = shalt.err (!%p655_p12)
}
  0x45   : > { %499 = dma.hbm_to_vmem [thread:$0]  (!%p866_p2), %s1012_s1, 512, %s180_s3, [#allocation6], %s769_s18, %s769_s18, %s770_s20  }
  0x46   : > { %p1022_p0 = scmp.ne.s32.totalorder %s1021_s27, 0 }
  0x47   : > { %s193_s4 = sand.u32 (!%p1022_p0), 1, %s754_s13   ;;  %p1023_p5 = scmp.ne.s32.totalorder (!%p1022_p0), %s1017_s21, 0 }
  0x48   : > { %191 = sbr.rel (%p1022_p0) target bundleno = 134 (0x86), region = 28  ;;  %s469_s5 = sshll.u32 (!%p1022_p0), %s193_s4, 5 }
  0x49   : > { %s194_s6 = scalar_lea.sflag (!%p1022_p0), [#allocation3], %s193_s4  ;;  %s197_s7 = scalar_lea.vmem (!%p1022_p0), [#allocation2], %s469_s5 }
  0x4f   : > { %724 = dma.done.wait (%p1023_p5), %s194_s6, 512  }
  0x50   : > { %726 = vsyncadd (%p1023_p5), %s194_s6, 4294966784  ;;  %s203_s29 = scalar_lea.sflag [#allocation6], %s193_s4  ;;  %s931_s8 = scalar_lea.vmem [#allocation5], %s469_s5 }
  0x51   : > { %728 = dma.done.wait (%p1023_p5), %s203_s29, 512  }
  0x52   : > { %730 = vsyncadd (%p1023_p5), %s203_s29, 4294966784  ;;  %v277_v0 = vld [vmem:[%s197_s7] sm:$0xff]  ;;  %v278_v1 = vld [vmem:[%s197_s7 + $0x8] sm:$0xff]  ;;  %v248_v8 = vlaneseq  ;;  %s472_s18 = sshll.u32 %s758_s14, 5  ;;  %s229_s21 = sand.u32 1, %s742_s10  }
  0x53   : > { %v279_v2 = vld [vmem:[%s197_s7 + $0x10] sm:$0xff]  ;;  %v280_v3 = vld [vmem:[%s197_s7 + $0x18] sm:$0xff]  ;;  %v473_v4 = vmul.f32 -1.442695, %v277_v0  ;;  %v474_v5 = vmul.f32 -1.442695, %v278_v1  ;;  %v255_v15 = vstv %s472_s18 }
  0x54   : > { %v475_v6 = vmul.f32 -1.442695, %v279_v2  ;;  %v476_v7 = vmul.f32 -1.442695, %v280_v3  ;;  %v249_v9 = vshrl.u32 %v248_v8, 7  ;;  %v281_v26 = vld [vmem:[%s931_s8] sm:$0xff] }
  0x55   : > { %583 = vpow2.f32 %v473_v4  ;;  %v282_v27 = vld [vmem:[%s931_s8 + $0x8] sm:$0xff]  ;;  %v283_v28 = vld [vmem:[%s931_s8 + $0x10] sm:$0xff]  ;;  %v284_v29 = vld [vmem:[%s931_s8 + $0x18] sm:$0xff]  ;;  %s471_s20 = sshll.u32 %s229_s21, 4  ;;  %s486_s27 = sshll.u32 %s758_s14, 8 }
  0x56   : > { %585 = vpow2.f32 %v474_v5  ;;  %v250_v14 = vadd.s32 8, %v249_v9  ;;  %v251_v18 = vadd.s32 16, %v249_v9  ;;  %v252_v20 = vadd.s32 24, %v249_v9  ;;  %s231_s3 = scalar_lea.vmem [#allocation7], %s471_s20  ;;  %s953_s22 = scalar_lea.hbm %s1013_s2, %s486_s27 }
  0x57   : > { %587 = vpow2.f32 %v475_v6  ;;  %v256_v22 = vadd.s32 %v255_v15, %v249_v9  ;;  %s354_s28 = sshll.u32 %s231_s3, 4  ;;  %s959_s23 = scalar_lea.sflag [#allocation4], %s229_s21  ;;  %s955_s28 = int_to_ptr.vmem [resolvable:$true] %s354_s28 }
  0x58   : > { %589 = vpow2.f32 %v476_v7  ;;  %v257_v23 = vadd.s32 %v255_v15, %v250_v14  ;;  %v258_v24 = vadd.s32 %v255_v15, %v251_v18  ;;  %v259_v25 = vadd.s32 %v255_v15, %v252_v20  ;;  %s659_s14 = scalar_lea.vmem %s955_s28, 256  ;;  %p1024_p8 = scmp.ne.s32.totalorder %s1018_s25, 0 }
  0x59   : > { %vm260_vm0 = vcmp.lt.s32.totalorder %v256_v22, 16  ;;  %p660_p2 = scmp.ne.s32.totalorder %s955_s28, %s659_s14  ;;  %s772_s30 = smov [#allocation7]  }
  0x5a   : > { %vm261_vm1 = vcmp.lt.s32.totalorder %v257_v23, 16  ;;  %vm262_vm2 = vcmp.lt.s32.totalorder %v258_v24, 16  ;;  %vm263_vm3 = vcmp.lt.s32.totalorder %v259_v25, 16  ;;  %v313_v30 = vsel %vm260_vm0, %v281_v26, 0.0  ;;  %s663_s4 = sshll.u32 %s772_s30, 4  ;;  %s664_s4 = int_to_ptr.vmem [resolvable:$false] %s663_s4 }
  0x5b   : > { %v314_v32 = vsel %vm261_vm1, %v282_v27, 0.0  ;;  %v315_v35 = vsel %vm262_vm2, %v283_v28, 0.0  ;;  %v316_v38 = vsel %vm263_vm3, %v284_v29, 0.0  ;;  %p661_p9 = pnand %p660_p2, %p1024_p8  ;;  %s665_s5 = scalar_lea.vmem %s664_s4, 512 }
  0x5c   : > { %p666_p11 = scmp.lt.s32.totalorder %s955_s28, %s664_s4  ;;  %p667_p1 = scmp.lt.s32.totalorder %s665_s5, %s659_s14 }
  0x5d   : > { %p662_p10 = pneg %p661_p9 }
  0x5e   : > { %p668_p3 = por %p667_p1, %p666_p11 }
  0x5f   : > { %v584_v10 = vpop.eup %583 }
  0x60   : > { %v586_v11 = vpop.eup %585  ;;  %v297_v12 = vadd.f32 1.0, %v584_v10  ;;  %p669_p7 = pnand %p668_p3, %p662_p10 }
  0x61   : > { %v588_v13 = vpop.eup %587  ;;  %v298_v16 = vadd.f32 1.0, %v586_v11 }
  0x62   : > { %v590_v17 = vpop.eup %589  ;;  %v299_v19 = vadd.f32 1.0, %v588_v13  ;;  %591 = vrcp.f32 %v297_v12 }
  0x63   : > { %v300_v21 = vadd.f32 1.0, %v590_v17  ;;  %593 = vrcp.f32 %v298_v16 }
  0x64   : > { %595 = vrcp.f32 %v299_v19 }
  0x65   : > { %597 = vrcp.f32 %v300_v21 }
  0x6c   : > { %v592_v31 = vpop.eup %591 }
  0x6d   : > { %v594_v33 = vpop.eup %593  ;;  %v309_v34 = vsel %vm260_vm0, %v592_v31, 0.0 }
  0x6e   : > { %v596_v36 = vpop.eup %595  ;;  %v310_v37 = vsel %vm261_vm1, %v594_v33, 0.0  ;;  %v317_v39 = vmul.f32 %v313_v30, %v309_v34  ;;  %v325_v40 = vadd.f32 %v313_v30, %v309_v34 }
  0x6f   : > { %v598_v41 = vpop.eup %597  ;;  %v311_v42 = vsel %vm262_vm2, %v596_v36, 0.0  ;;  %v318_v43 = vmul.f32 %v314_v32, %v310_v37  ;;  %v326_v44 = vadd.f32 %v314_v32, %v310_v37 }
  0x70   : > { %v312_v45 = vsel %vm263_vm3, %v598_v41, 0.0  ;;  %v319_v46 = vmul.f32 %v315_v35, %v311_v42  ;;  %v327_v47 = vadd.f32 %v315_v35, %v311_v42 }
  0x71   : > { %v320_v48 = vmul.f32 %v316_v38, %v312_v45  ;;  %v321_v49 = vadd.f32 %v318_v43, %v317_v39  ;;  %v328_v50 = vadd.f32 %v316_v38, %v312_v45  ;;  %v329_v51 = vadd.f32 %v326_v44, %v325_v40 }
  0x73   : > { %v322_v52 = vadd.f32 %v321_v49, %v319_v46  ;;  %v330_v53 = vadd.f32 %v329_v51, %v327_v47 }
  0x75   : > { %v323_v54 = vadd.f32 %v322_v52, %v320_v48  ;;  %v331_v55 = vadd.f32 %v330_v53, %v328_v50 }
  0x77   : > { %335 = vst [vmem:[%s231_s3] sm:$0xff] %v323_v54  ;;  %478 = vst [vmem:[%s231_s3 + $0x8] sm:$0xff] %v331_v55 }
  0x78   : > { %672 = shalt.err (!%p669_p7)
}
  0x79   : > { %s673_s6 = scalar_lea.hbm %s953_s22, 256  ;;  %s677_s8 = scalar_lea.hbm %s1013_s2, 512 }
  0x7a   : > { %p674_p13 = scmp.ne.s32.totalorder %s953_s22, %s673_s6  ;;  %p678_p12 = scmp.lt.u32.totalorder %s953_s22, %s1013_s2 }
  0x7b   : > { %p679_p0 = scmp.lt.u32.totalorder %s677_s8, %s673_s6  ;;  %p681_p2 = scmp.lt.u32.totalorder %s673_s6, %s953_s22 }
  0x7c   : > { %p675_p4 = pnand %p674_p13, %p1024_p8 }
  0x7d   : > { %p680_p5 = por %p679_p0, %p678_p12 }
  0x7e   : > { %p676_p6 = pneg %p675_p4 }
  0x7f   : > { %p682_p9 = por %p681_p2, %p680_p5 }
  0x81   : > { %p683_p10 = pnand %p682_p9, %p676_p6 }
  0x83   : > { %686 = shalt.err (!%p683_p10)
}
  0x84   : > { %s773_s20 = smov 128   ;;  %s774_s27 = smov 8  }
  0x85   : > { %491 = dma.vmem_to_hbm [thread:$0]  (%p1024_p8), %s955_s28, 256, %s953_s22, %s959_s23, %s773_s20, %s773_s20, %s774_s27  }
  0x86 PF: > { %s369_s3 = sand.u32 1, %s738_s9   ;;  %p1025_p11 = scmp.ne.s32.totalorder %s1019_s26, 0 }
  0x87   : > { %p1026_p1 = scmp.ge.s32.totalorder %s766_s16, 2  ;;  %s370_s12 = scalar_lea.sflag [#allocation4], %s369_s3 }
  0x89   : > { %p501_p3 = pnand %p1026_p1, %p1025_p11 }
  0x8b   : > { %732 = dma.done.wait (!%p501_p3), %s370_s12, 256  }
  0x8c   : > { %734 = vsyncadd (!%p501_p3), %s370_s12, 4294967040  ;;  %s21_s16 = sadd.s32 1, %s766_s16   ;;  %s1027_s9 = smov %s742_s10 }
  0x8d   : > { %p18_p7 = scmp.ge.s32.totalorder %s21_s16, 4   ;;  %s1028_s10 = smov %s746_s11 }
  0x8e   : > { %s1029_s11 = smov %s848_s24  ;;  %s1030_s12 = smov %s754_s13 }
  0x8f   : > { %s1001_s13 = smov 0   ;;  %s1031_s14 = smov %s762_s15 }
  0x90   : > { %s1032_s15 = smov %s1034_s19  ;;  %20 = sbr.rel (!%p18_p7) target bundleno = 9 (0x9), region = 91 }
  0x97   :  { %375 = vsyncpa [#allocation3], 1 }
  0x98   :  { %377 = vsyncpa [#allocation3 + $0x1], 1 }
  0x99   :  { %378 = vsyncpa [#allocation6], 1 }
  0x9a   :  { %380 = vsyncpa [#allocation6 + $0x1], 1 }
  0x9b   :  { %381 = vsyncpa [#allocation4], 1 }
  0x9c   :  { %383 = vsyncpa [#allocation4 + $0x1], 1 }

</bundles_post_ra>
